<compile_context>
chip_gen: v6e
topology: v6e:2x2x1
jax: 0.10.0
libtpu: 0.0.40
codegen_flags: <defaults>
</compile_context>

<pallas_src>
import math

import jax
import jax.numpy as jnp
from jax.experimental import pallas as pl
from jax.experimental.pallas import tpu as pltpu


def _round_up(x, m):
    return ((x + m - 1) // m) * m


def _balanced_tile(extent, max_tile, align):
    """Largest tile <= max_tile (multiple of `align`) that tiles `extent` with
    minimal padding (ceil-divided extent instead of clamping to the cap)."""
    extent_aligned = _round_up(max(extent, 1), align)
    if extent_aligned <= max_tile:
        return extent_aligned
    n_tiles = -(-extent // max_tile)                 # ceil
    return _round_up(-(-extent // n_tiles), align)   # <= max_tile (cap is align-multiple)


# ---------------------------------------------------------------------------
# Kernels
# ---------------------------------------------------------------------------
def _linear_kernel(x_ref, w_ref, b_ref, o_ref):
    """Single-K-strip kernel (also the tiny-problem fast path).

    x: (tm, K)  w: (K, tn)  b: (1, tn)  o: (tm, tn)
    """
    o_ref[...] = (
        jnp.dot(x_ref[...], w_ref[...], preferred_element_type=jnp.float32)
        + b_ref[...]
    ).astype(o_ref.dtype)


def _linear_kernel_ksplit(x_ref, w_ref, b_ref, o_ref):
    """K-split kernel: accumulate directly into the resident f32 output tile.

    x: (tm, tk)  w: (tk, tn)  b: (1, tn)  o: (tm, tn) f32, block index independent of k.
    """
    k = pl.program_id(2)

    @pl.when(k == 0)
    def _init():
        o_ref[...] = jnp.zeros_like(o_ref)

    o_ref[...] += jnp.dot(x_ref[...], w_ref[...], preferred_element_type=jnp.float32)

    @pl.when(k == pl.num_programs(2) - 1)
    def _finalize():
        o_ref[...] += b_ref[...]


# ---------------------------------------------------------------------------
# Module wrapper
# ---------------------------------------------------------------------------
class PallasLinear:
    """nn.Linear forward on TPU via Pallas.

    weight: (out_dim, in_dim) PyTorch layout, bias: (out_dim,).
    All one-time parameter work (transpose, padding, optional cast) happens here,
    not in the per-call forward path.
    """

    def __init__(self, weight, bias, *, compute_dtype=None,
                 tm_max=512, tn_max=512, tk_max=1024,
                 fast_path_bytes=8 * 1024 * 1024):
        out_dim, in_dim = weight.shape
        assert bias.shape == (out_dim,)
        self.N, self.K = out_dim, in_dim
        self.compute_dtype = compute_dtype        # e.g. jnp.bfloat16 (opt-in, v5e/v6e)
        self.tm_max = tm_max
        self.fast_path_bytes = fast_path_bytes

        # One-time transpose to (K, N): the kernel contracts (tm,tk)x(tk,tn) on the
        # MXU with no per-step XLU transpose of the weight tile.
        wt = weight.T
        if compute_dtype is not None:
            wt = wt.astype(compute_dtype)
        self.wt = wt                                           # (K, N), unpadded (fast path)
        self.bias2 = bias.reshape(1, out_dim).astype(jnp.float32)

        # Tiled path: balanced tiles, padding done once here.
        self.tn = _balanced_tile(self.N, tn_max, 128)
        self.tk = _balanced_tile(self.K, tk_max, 128)
        self.Np = _round_up(self.N, self.tn)
        self.Kp = _round_up(self.K, self.tk)
        self.wt_padded = jnp.pad(wt, ((0, self.Kp - self.K), (0, self.Np - self.N)))
        self.bias_padded = jnp.pad(self.bias2, ((0, 0), (0, self.Np - self.N)))

    def __call__(self, x):
        M, K = x.shape
        assert K == self.K
        cd = self.compute_dtype
        xk = x.astype(cd) if cd is not None else x

        # ---- Fast path: whole problem fits comfortably in VMEM -> single block,
        # no grid, no padding, no post-kernel slice.
        total_bytes = 4 * (M * K + self.K * self.N + M * self.N + self.N)
        if total_bytes <= self.fast_path_bytes:
            return pl.pallas_call(
                _linear_kernel,
                out_shape=jax.ShapeDtypeStruct((M, self.N), jnp.float32),
            )(xk, self.wt, self.bias2)

        # ---- Tiled path.
        tm = _balanced_tile(M, self.tm_max, 8)
        Mp = _round_up(M, tm)
        grid_m, grid_n = Mp // tm, self.Np // self.tn
        # v7x has 2 TensorCores: make sure the parallel axes have >= 2 points when M allows.
        if grid_m * grid_n == 1 and Mp >= 16:
            tm = _round_up(-(-Mp // 2), 8)
            Mp = _round_up(M, tm)
            grid_m = Mp // tm

        if (Mp, self.Kp) != (M, K):
            xk = jnp.pad(xk, ((0, Mp - M), (0, self.Kp - K)))

        tn, tk, Np, Kp = self.tn, self.tk, self.Np, self.Kp
        n_k = Kp // tk

        if n_k == 1:
            # Collapsed-K: full K strip per tile, write output directly (no scratch,
            # no pl.when, no per-K-step pipeline overhead).
            kernel = _linear_kernel
            grid = (grid_m, grid_n)
            in_specs = [
                pl.BlockSpec((tm, Kp), lambda i, j: (i, 0)),   # x strip
                pl.BlockSpec((Kp, tn), lambda i, j: (0, j)),   # W^T strip (pre-transposed)
                pl.BlockSpec((1, tn), lambda i, j: (0, j)),    # bias
            ]
            out_spec = pl.BlockSpec((tm, tn), lambda i, j: (i, j))
            semantics = ("parallel", "parallel")
        else:
            # Large K: reduction axis last, accumulate into the resident f32 output tile.
            kernel = _linear_kernel_ksplit
            grid = (grid_m, grid_n, n_k)
            in_specs = [
                pl.BlockSpec((tm, tk), lambda i, j, k: (i, k)),
                pl.BlockSpec((tk, tn), lambda i, j, k: (k, j)),
                pl.BlockSpec((1, tn), lambda i, j, k: (0, j)),
            ]
            out_spec = pl.BlockSpec((tm, tn), lambda i, j, k: (i, j))
            semantics = ("parallel", "parallel", "arbitrary")

        out = pl.pallas_call(
            kernel,
            out_shape=jax.ShapeDtypeStruct((Mp, Np), jnp.float32),
            grid_spec=pltpu.PrefetchScalarGridSpec(
                num_scalar_prefetch=0,
                grid=grid,
                in_specs=in_specs,
                out_specs=out_spec,
            ),
            compiler_params=pltpu.CompilerParams(
                dimension_semantics=semantics,
                # Double-buffered f32 tiles at the default caps are ~10 MiB; 48 MiB
                # leaves headroom while staying under v7x's 64 MiB physical VMEM.
                vmem_limit_bytes=48 * 1024 * 1024,
            ),
        )(xk, self.wt_padded, self.bias_padded)

        return out[:M, : self.N]


if __name__ == "__main__":
    key = jax.random.PRNGKey(0)
    kx, kw, kb, kx2, kw2, kb2 = jax.random.split(key, 6)

    # --- Small shapes consistent with the module: batch=8, in_dim=32, out_dim=16 ---
    batch, in_dim, out_dim = 8, 32, 16
    x = jax.random.normal(kx, (batch, in_dim), dtype=jnp.float32)
    bound = 1.0 / (in_dim ** 0.5)   # nn.Linear-style uniform init
    weight = jax.random.uniform(kw, (out_dim, in_dim), jnp.float32, -bound, bound)
    bias = jax.random.uniform(kb, (out_dim,), jnp.float32, -bound, bound)

    model = PallasLinear(weight, bias)     # one-time param prep (transpose/pad) hoisted here
    y = model(x)                           # tiny shape -> single-block fast path
    jax.block_until_ready(y)

    y_ref = x @ weight.T + bias
    assert y.shape == (batch, out_dim)
    assert jnp.allclose(y, y_ref, atol=1e-5, rtol=1e-5)

    # --- Exercise the tiled K-split path (fast path disabled) at a modest size ---
    M2, K2, N2 = 96, 1536, 256
    x2 = jax.random.normal(kx2, (M2, K2), dtype=jnp.float32)
    bound2 = 1.0 / (K2 ** 0.5)
    weight2 = jax.random.uniform(kw2, (N2, K2), jnp.float32, -bound2, bound2)
    bias2 = jax.random.uniform(kb2, (N2,), jnp.float32, -bound2, bound2)

    model2 = PallasLinear(weight2, bias2, fast_path_bytes=0)   # force tiled path
    y2 = model2(x2)
    jax.block_until_ready(y2)

    y2_ref = x2 @ weight2.T + bias2
    assert y2.shape == (M2, N2)
    assert jnp.allclose(y2, y2_ref, atol=2e-2, rtol=2e-2)

    print("KERNEL_OK")
</pallas_src>

<mosaic_0001>
module attributes {stable_mosaic.version = 11 : i64} {
  func.func @_linear_kernel(%arg0: memref<8x32xf32, #tpu.memory_space<vmem>>, %arg1: memref<32x16xf32, #tpu.memory_space<vmem>>, %arg2: memref<1x16xf32, #tpu.memory_space<vmem>>, %arg3: memref<8x16xf32, #tpu.memory_space<vmem>>) attributes {dimension_semantics = [], scalar_prefetch = 0 : i64, scratch_operands = 0 : i64, tpu.core_type = #tpu.core_type<tc>} {
    %c0 = arith.constant 0 : index
    %c0_0 = arith.constant 0 : index
    %0 = vector.load %arg0[%c0, %c0_0] : memref<8x32xf32, #tpu.memory_space<vmem>>, vector<8x32xf32>
    %c0_1 = arith.constant 0 : index
    %c0_2 = arith.constant 0 : index
    %1 = vector.load %arg1[%c0_1, %c0_2] : memref<32x16xf32, #tpu.memory_space<vmem>>, vector<32x16xf32>
    %cst = arith.constant dense<0.000000e+00> : vector<8x16xf32>
    %2 = tpu.matmul %0, %1, %cst {dimension_numbers = #tpu.dot_dimension_numbers<[1], [0], [0], [1], [0, 0, 1, 1], [], []>} : vector<8x32xf32>, vector<32x16xf32>, vector<8x16xf32> -> vector<8x16xf32>
    %c0_3 = arith.constant 0 : index
    %c0_4 = arith.constant 0 : index
    %3 = vector.load %arg2[%c0_3, %c0_4] : memref<1x16xf32, #tpu.memory_space<vmem>>, vector<1x16xf32>
    %4 = vector.broadcast %3 : vector<1x16xf32> to vector<8x16xf32>
    %5 = arith.addf %2, %4 : vector<8x16xf32>
    %c0_5 = arith.constant 0 : index
    %c0_6 = arith.constant 0 : index
    %6 = vector.load %arg3[%c0_5, %c0_6] : memref<8x16xf32, #tpu.memory_space<vmem>>, vector<8x16xf32>
    tpu.vector_store %arg3[%c0_5, %c0_6], %5 {strides = array<i32>} : memref<8x16xf32, #tpu.memory_space<vmem>>, vector<8x16xf32>,
    return
  }
}

</mosaic_0001>

<bundles_post_ra>
// kernel: tpu_custom_call.1
= control target key start
LH: loop header
LB: loop body
LE: loop exit
PB: predicated region body
PF: predicated region fallthrough
CT: control target
= control target key end

     0   :  { %v160_v1 = vmov 0.0   ;;  %vm161_vm0 = vmmov 0   ;;  %s204_s0 = inlined_call_operand.vmem [shape: f32[8,32], index: 0, kind: input, shape index: {}]   ;;  %s205_s1 = inlined_call_operand.vmem [shape: f32[32,16], index: 1, kind: input, shape index: {}]   ;;  %s206_s2 = inlined_call_operand.vmem [shape: f32[1,16], index: 2, kind: input, shape index: {}]   ;;  %s207_s3 = inlined_call_operand.hbm [shape: f32[8,16], index: 3, kind: output, shape index: {}]  }
   0x1   :  { %v19_v0 = vld [vmem:[%s205_s1 + $0x18] sm:$0xff]  ;;  %124 = vmatprep.subr.mxu0 %v160_v1  ;;  %v18_v2 = vld [vmem:[%s205_s1 + $0x10] sm:$0xff]  ;;  %132 = vmatprep.mubr.msk.f32.mxu0 %vm161_vm0, %v160_v1 }
   0x2   :  { %125 = vmatpush3.msra.mxu0 %v19_v0 }
   0x3   :  { %8 = vsyncpa [#allocation3], 0  ;;  %126 = vmatprep.subr.mxu0 %v160_v1  ;;  %v17_v3 = vld [vmem:[%s205_s1 + $0x8] sm:$0xff]  ;;  %v16_v4 = vld [vmem:[%s205_s1] sm:$0xff]  ;;  %vm27_vm1 = vcmask 261120   ;;  %s162_s24 = smov [#allocation2]  }
   0x4   :  { %127 = vmatpush3.msra.mxu0 %v18_v2  ;;  %v15_v5 = vld [vmem:[%s204_s0] sm:$0xff]  ;;  %s109_s25 = sshll.u32 %s162_s24, 4  ;;  %vm101_vm2 = vcmask 130048   ;;  %s110_s25 = int_to_ptr.vmem [resolvable:$true] %s109_s25 }
   0x5   :  { %128 = vmatprep.subr.mxu0 %v160_v1  ;;  %v117_v6 = vld [vmem:[%s206_s2] ss:$0 sm:$0xff]  ;;  %s138_s1 = scalar_lea.vmem %s110_s25, 128  ;;  %p143_p1 = scmp.lt.s32.totalorder %s110_s25, %s110_s25 }
   0x6   :  { %129 = vmatpush3.msra.mxu0 %v17_v3  ;;  %p139_p0 = scmp.ne.s32.totalorder %s110_s25, %s138_s1  ;;  %p144_p2 = scmp.lt.s32.totalorder %s138_s1, %s138_s1 }
   0x7   :  { %130 = vmatprep.subr.mxu0 %v160_v1 }
   0x8   :  { %131 = vmatpush3.msra.mxu0 %v16_v4  ;;  %p145_p3 = por %p144_p2, %p143_p1 }
   0x9   :  { %133 = vmatmul.mubr.msk.f32.vlgmr.msra.gmra.mxu0 %vm27_vm1, %v15_v5 }
   0xa   :  { %p146_p4 = pnand %p145_p3, %p139_p0 }
  0xc9   :  { %v97_v7 = vpop.f32.mrf.mxu0 }
  0xca   :  { %v98_v8 = vadd.f32 %v117_v6, %v97_v7 }
  0xcb   :  { %v134_v9 = vpop.f32.mrf.mxu0 }
  0xcc   :  { %102 = vst.msk [vmem:[#allocation2] sm:$0xff] %vm101_vm2, %v98_v8 }
  0xcd   :  { %149 = shalt.err (!%p146_p4)
}
  0xce   :  { %112 = dma.vmem_to_hbm [thread:$0]  %s110_s25, 128, %s207_s3, [#allocation3]  }
  0xcf   :  { %158 = dma.done.wait [#allocation3], 128  }
  0xd0   :  { %159 = vsyncadd [#allocation3], 4294967168 }
  0xd1   :  { %116 = vsyncpa [#allocation3], 1 }

</bundles_post_ra>
